<compile_context>
chip_gen: v7x
topology: tpu7x:2x2x1
jax: 0.10.0
libtpu: 0.0.40
codegen_flags: <defaults>
</compile_context>

<pallas_src>
import functools

import jax
import jax.numpy as jnp
from jax.experimental import pallas as pl
from jax.experimental.pallas import tpu as pltpu


def _round_up(x, m):
    return ((x + m - 1) // m) * m


# ----------------------------- Pallas kernel ------------------------------- #
def _mind_decoder_kernel(
    act_ref,       # SMEM [B]                         int32 (discrete action id)
    prev_obs_ref,  # VMEM [B, input_dim]              f32
    h0_ref,        # VMEM [n_layers, B, H]            f32
    w_emb_ref,     # VMEM [obs_rows + action_dim, H]  f32 (rows: obs | pad | action)
    w_lstm_ref,    # VMEM [n_layers, 2H, 3H]          f32 (rows ih|hh, cols i|g|o)
    b_all_ref,     # VMEM [n_layers + 1, 1, BC]       f32 (LSTM gate biases, head bias)
    w_head_ref,    # VMEM [H, head_pad]               f32 (obs | reward | done | 0-pad)
    out_ref,       # VMEM [B, head_pad]               f32 (done column pre-sigmoid'ed)
):
    n_layers, B, H = h0_ref.shape
    input_dim = prev_obs_ref.shape[1]
    obs_rows = _round_up(input_dim, 8)
    action_dim = w_emb_ref.shape[0] - obs_rows
    G = w_lstm_ref.shape[2]                       # 3H
    out_cols = out_ref.shape[1]

    # ---- one_hot(action) from SMEM scalars (VPU iota compare, no VMEM DMA) ----
    # Out-of-range / negative ids yield an all-zero row (like jax.nn.one_hot;
    # torch F.one_hot would error instead).
    row = jax.lax.broadcasted_iota(jnp.int32, (B, action_dim), 0)
    lane = jax.lax.broadcasted_iota(jnp.int32, (B, action_dim), 1)
    act_b = jnp.zeros((B, action_dim), jnp.int32)
    for b in range(B):                             # static unroll, tiny B
        act_b = jnp.where(row == b, act_ref[b], act_b)
    one_hot = (lane == act_b).astype(jnp.float32)  # [B, action_dim]

    # ---- context embed: two dots instead of a lane-offset concat + dot ----
    # (b_emb folded into the layer-0 gate bias in pack_params.)
    emb = (
        jnp.dot(prev_obs_ref[:, :], w_emb_ref[:input_dim, :],
                preferred_element_type=jnp.float32)
        + jnp.dot(one_hot, w_emb_ref[obs_rows:, :],
                  preferred_element_type=jnp.float32)
    )                                              # [B, H]

    # ---- hh contributions hoisted off the serial layer chain ----
    hh_pre = [
        jnp.dot(h0_ref[l], w_lstm_ref[l, H:, :], preferred_element_type=jnp.float32)
        + b_all_ref[l, :, :G]
        for l in range(n_layers)
    ]                                              # each [B, 3H]

    # ---- stacked LSTM, single step, c0 == 0 (f-gate pruned). Gate order i|g|o ----
    layer_in = emb
    for l in range(n_layers):
        gates = (
            jnp.dot(layer_in, w_lstm_ref[l, :H, :], preferred_element_type=jnp.float32)
            + hh_pre[l]
        )                                          # [B, 3H]
        sg = jax.nn.sigmoid(gates)                 # full-width: one vreg at H=32
        th = jnp.tanh(gates)
        i_g = sg[:, 0:H]
        g_g = th[:, H:2 * H]
        o_g = sg[:, 2 * H:3 * H]
        layer_in = o_g * jnp.tanh(i_g * g_g)       # f * c0 == 0 dropped

    # ---- fused heads: one matmul, one lane-dense (128-padded) output slab ----
    raw = (
        jnp.dot(layer_in, w_head_ref[:, :], preferred_element_type=jnp.float32)
        + b_all_ref[n_layers, :, :out_cols]
    )                                              # [B, head_pad]
    col = jax.lax.broadcasted_iota(jnp.int32, (B, out_cols), 1)
    # sigmoid only applies to the `done` column (input_dim + 1).
    out_ref[...] = jnp.where(col == input_dim + 1, jax.nn.sigmoid(raw), raw)


# ------------------------------ JAX wrapper -------------------------------- #
def mind_decoder_forward(packed_params, config, hidden_state, action, prev_obs):
    """hidden_state: [n_layers, B, H], action: [B] int32, prev_obs: [B, input_dim]."""
    del config  # all static dims are derived from array shapes
    B, input_dim = prev_obs.shape
    head_pad = packed_params["w_head"].shape[1]

    vmem = pl.BlockSpec(memory_space=pltpu.MemorySpace.VMEM)
    smem = pl.BlockSpec(memory_space=pltpu.MemorySpace.SMEM)
    packed_out = pl.pallas_call(
        _mind_decoder_kernel,
        out_shape=jax.ShapeDtypeStruct((B, head_pad), jnp.float32),
        in_specs=[smem, vmem, vmem, vmem, vmem, vmem, vmem],
        out_specs=vmem,
    )(
        action.astype(jnp.int32),
        prev_obs,
        hidden_state,
        packed_params["w_emb"],
        packed_params["w_lstm"],
        packed_params["b_all"],
        packed_params["w_head"],
    )

    next_obs = packed_out[:, :input_dim]
    reward = packed_out[:, input_dim:input_dim + 1]
    done = packed_out[:, input_dim + 1:input_dim + 2]
    return next_obs, reward, done


# --------------------------- parameter init (PyTorch layout) ---------------- #
def init_params(key, config):
    """Parameters in PyTorch layout: Linear weight [out, in], LSTM [4H, H]."""
    H = config["hidden_dim"]
    input_dim = config["input_dim"]
    action_dim = config["action_dim"]
    n_layers = config["n_layers"]
    ctx_dim = input_dim + action_dim

    keys = jax.random.split(key, 16)

    def u(k, shape, fan_in):
        bound = 1.0 / jnp.sqrt(fan_in)
        return jax.random.uniform(k, shape, jnp.float32, -bound, bound)

    return {
        "emb_w": u(keys[0], (H, ctx_dim), ctx_dim),
        "emb_b": u(keys[1], (H,), ctx_dim),
        # LSTM gate order i, f, g, o (PyTorch convention).
        "w_ih": u(keys[2], (n_layers, 4 * H, H), H),
        "w_hh": u(keys[3], (n_layers, 4 * H, H), H),
        "b_ih": u(keys[4], (n_layers, 4 * H), H),
        "b_hh": u(keys[5], (n_layers, 4 * H), H),
        "obs_w": u(keys[6], (input_dim, H), H),
        "obs_b": u(keys[7], (input_dim,), H),
        "rew_w": u(keys[8], (1, H), H),
        "rew_b": u(keys[9], (1,), H),
        "done_w": u(keys[10], (1, H), H),
        "done_b": u(keys[11], (1,), H),
    }


# ------------------- pack PyTorch-layout params for the kernel -------------- #
def pack_params(tp, config):
    H = config["hidden_dim"]
    input_dim = config["input_dim"]
    action_dim = config["action_dim"]
    n_layers = config["n_layers"]
    head_dim = input_dim + 2
    head_pad = _round_up(head_dim, 128)
    obs_rows = _round_up(input_dim, 8)

    # context embed: [H, ctx_dim] -> transpose, split at input_dim, obs block padded
    # to a multiple-of-8 sublane boundary so the in-kernel slices stay aligned.
    w_emb_t = tp["emb_w"].T                                            # [ctx_dim, H]
    w_emb = jnp.zeros((obs_rows + action_dim, H), jnp.float32)
    w_emb = w_emb.at[:input_dim].set(w_emb_t[:input_dim])
    w_emb = w_emb.at[obs_rows:].set(w_emb_t[input_dim:])

    # LSTM: transpose to [L, H, 4H], drop f-gate columns (c0 == 0), keep i | g | o,
    # then stack ih over hh -> [L, 2H, 3H].
    def igo(w_t):
        return jnp.concatenate([w_t[..., 0:H], w_t[..., 2 * H:4 * H]], axis=-1)

    w_ih_igo = igo(jnp.transpose(tp["w_ih"], (0, 2, 1)))               # [L, H, 3H]
    w_hh_igo = igo(jnp.transpose(tp["w_hh"], (0, 2, 1)))               # [L, H, 3H]
    w_lstm = jnp.concatenate([w_ih_igo, w_hh_igo], axis=1)             # [L, 2H, 3H]

    b_sum = tp["b_ih"] + tp["b_hh"]                                    # [L, 4H]
    b_lstm = jnp.concatenate([b_sum[:, 0:H], b_sum[:, 2 * H:4 * H]], axis=1)  # [L, 3H]
    # fold the context-embed bias into the layer-0 gate bias: b_emb @ W_ih[0]
    b_lstm = b_lstm.at[0].add(tp["emb_b"] @ w_ih_igo[0])

    # heads fused + 128-lane padded: [H, head_pad] (obs | reward | done | zero pad)
    w_head_full = jnp.concatenate([tp["obs_w"], tp["rew_w"], tp["done_w"]], axis=0).T
    w_head = jnp.zeros((H, head_pad), jnp.float32).at[:, :head_dim].set(w_head_full)
    b_head_full = jnp.concatenate([tp["obs_b"], tp["rew_b"], tp["done_b"]], axis=0)

    # all biases in one buffer: rows 0..L-1 = LSTM gate biases, row L = head bias.
    bc = max(3 * H, head_pad)
    b_all = jnp.zeros((n_layers + 1, 1, bc), jnp.float32)
    b_all = b_all.at[:n_layers, 0, :3 * H].set(b_lstm)
    b_all = b_all.at[n_layers, 0, :head_dim].set(b_head_full)

    return {"w_emb": w_emb, "w_lstm": w_lstm, "b_all": b_all, "w_head": w_head}


# --------------------------- pure-JAX reference ----------------------------- #
def reference_forward(tp, config, hidden_state, action, prev_obs):
    """Faithful re-implementation of MindDecoder.forward with PyTorch-layout params."""
    H = config["hidden_dim"]
    one_hot = jax.nn.one_hot(action, config["action_dim"], dtype=jnp.float32)
    x = jnp.concatenate([prev_obs, one_hot], axis=-1)
    layer_in = x @ tp["emb_w"].T + tp["emb_b"]
    for l in range(config["n_layers"]):
        gates = (layer_in @ tp["w_ih"][l].T
                 + hidden_state[l] @ tp["w_hh"][l].T
                 + tp["b_ih"][l] + tp["b_hh"][l])
        i_g = jax.nn.sigmoid(gates[:, 0 * H:1 * H])
        f_g = jax.nn.sigmoid(gates[:, 1 * H:2 * H])
        g_g = jnp.tanh(gates[:, 2 * H:3 * H])
        o_g = jax.nn.sigmoid(gates[:, 3 * H:4 * H])
        c_new = f_g * jnp.zeros_like(g_g) + i_g * g_g   # c0 == 0
        layer_in = o_g * jnp.tanh(c_new)
    out = layer_in
    next_obs = out @ tp["obs_w"].T + tp["obs_b"]
    reward = out @ tp["rew_w"].T + tp["rew_b"]
    done = jax.nn.sigmoid(out @ tp["done_w"].T + tp["done_b"])
    return next_obs, reward, done


# --------------------------------- main ------------------------------------ #
if __name__ == "__main__":
    config = {
        "hidden_dim": 32,
        "n_layers": 2,
        "input_dim": 16,
        "action_dim": 4,
        # "mlp_add": False  (module default)
    }
    B = 2

    root = jax.random.PRNGKey(0)
    k_params, k_h, k_obs, k_act = jax.random.split(root, 4)

    torch_params = init_params(k_params, config)
    packed_params = pack_params(torch_params, config)

    hidden_state = jax.random.normal(
        k_h, (config["n_layers"], B, config["hidden_dim"]), jnp.float32)
    prev_obs = jax.random.normal(k_obs, (B, config["input_dim"]), jnp.float32)
    action = jax.random.randint(k_act, (B,), 0, config["action_dim"], jnp.int32)
    assert int(jnp.max(action)) < config["action_dim"]

    fwd = jax.jit(functools.partial(mind_decoder_forward, packed_params, config))
    next_obs, reward, done = fwd(hidden_state, action, prev_obs)
    jax.block_until_ready((next_obs, reward, done))

    ref_obs, ref_rew, ref_done = reference_forward(
        torch_params, config, hidden_state, action, prev_obs)

    assert next_obs.shape == (B, config["input_dim"])
    assert reward.shape == (B, 1) and done.shape == (B, 1)
    assert jnp.allclose(next_obs, ref_obs, atol=1e-4, rtol=1e-4)
    assert jnp.allclose(reward, ref_rew, atol=1e-4, rtol=1e-4)
    assert jnp.allclose(done, ref_done, atol=1e-4, rtol=1e-4)

    print("KERNEL_OK")
</pallas_src>

<mosaic_0001>
module attributes {stable_mosaic.version = 11 : i64} {
  func.func @_mind_decoder_kernel(%arg0: memref<2xi32, #tpu.memory_space<smem>>, %arg1: memref<2x16xf32, #tpu.memory_space<vmem>>, %arg2: memref<2x2x32xf32, #tpu.memory_space<vmem>>, %arg3: memref<20x32xf32, #tpu.memory_space<vmem>>, %arg4: memref<2x64x96xf32, #tpu.memory_space<vmem>>, %arg5: memref<3x1x128xf32, #tpu.memory_space<vmem>>, %arg6: memref<32x128xf32, #tpu.memory_space<vmem>>, %arg7: memref<2x128xf32, #tpu.memory_space<vmem>>) attributes {dimension_semantics = [], scalar_prefetch = 0 : i64, scratch_operands = 0 : i64, tpu.core_type = #tpu.core_type<tc>} {
    %0 = tpu.iota {dimensions = array<i32: 0>} : vector<2x4xi32>
    %1 = tpu.iota {dimensions = array<i32: 1>} : vector<2x4xi32>
    %c0_i32 = arith.constant 0 : i32
    %2 = vector.broadcast %c0_i32 : i32 to vector<2x4xi32>
    %c0_i32_0 = arith.constant 0 : i32
    %3 = vector.broadcast %c0_i32_0 : i32 to vector<2x4xi32>
    %4 = arith.cmpi eq, %0, %3 : vector<2x4xi32>
    %c0 = arith.constant 0 : index
    %5 = memref.load %arg0[%c0] : memref<2xi32, #tpu.memory_space<smem>>
    %6 = vector.broadcast %5 : i32 to vector<2x4xi32>
    %7 = arith.select %4, %6, %2 : vector<2x4xi1>, vector<2x4xi32>
    %c1_i32 = arith.constant 1 : i32
    %8 = vector.broadcast %c1_i32 : i32 to vector<2x4xi32>
    %9 = arith.cmpi eq, %0, %8 : vector<2x4xi32>
    %c1 = arith.constant 1 : index
    %10 = memref.load %arg0[%c1] : memref<2xi32, #tpu.memory_space<smem>>
    %11 = vector.broadcast %10 : i32 to vector<2x4xi32>
    %12 = arith.select %9, %11, %7 : vector<2x4xi1>, vector<2x4xi32>
    %13 = arith.cmpi eq, %1, %12 : vector<2x4xi32>
    %14 = arith.extui %13 : vector<2x4xi1> to vector<2x4xi32>
    %15 = arith.sitofp %14 : vector<2x4xi32> to vector<2x4xf32>
    %c0_1 = arith.constant 0 : index
    %c0_2 = arith.constant 0 : index
    %16 = vector.load %arg1[%c0_1, %c0_2] : memref<2x16xf32, #tpu.memory_space<vmem>>, vector<2x16xf32>
    %c0_3 = arith.constant 0 : index
    %c0_4 = arith.constant 0 : index
    %17 = vector.load %arg3[%c0_3, %c0_4] : memref<20x32xf32, #tpu.memory_space<vmem>>, vector<16x32xf32>
    %cst = arith.constant dense<0.000000e+00> : vector<2x32xf32>
    %18 = tpu.matmul %16, %17, %cst {dimension_numbers = #tpu.dot_dimension_numbers<[1], [0], [0], [1], [0, 0, 1, 1], [], []>} : vector<2x16xf32>, vector<16x32xf32>, vector<2x32xf32> -> vector<2x32xf32>
    %c16 = arith.constant 16 : index
    %c0_5 = arith.constant 0 : index
    %19 = vector.load %arg3[%c16, %c0_5] : memref<20x32xf32, #tpu.memory_space<vmem>>, vector<4x32xf32>
    %cst_6 = arith.constant dense<0.000000e+00> : vector<2x32xf32>
    %20 = tpu.matmul %15, %19, %cst_6 {dimension_numbers = #tpu.dot_dimension_numbers<[1], [0], [0], [1], [0, 0, 1, 1], [], []>} : vector<2x4xf32>, vector<4x32xf32>, vector<2x32xf32> -> vector<2x32xf32>
    %21 = arith.addf %18, %20 : vector<2x32xf32>
    %c0_7 = arith.constant 0 : index
    %c0_8 = arith.constant 0 : index
    %c0_9 = arith.constant 0 : index
    %22 = vector.load %arg2[%c0_7, %c0_8, %c0_9] : memref<2x2x32xf32, #tpu.memory_space<vmem>>, vector<1x2x32xf32>
    %23 = vector.shape_cast %22 : vector<1x2x32xf32> to vector<2x32xf32>
    %c0_10 = arith.constant 0 : index
    %c32 = arith.constant 32 : index
    %c0_11 = arith.constant 0 : index
    %24 = vector.load %arg4[%c0_10, %c32, %c0_11] : memref<2x64x96xf32, #tpu.memory_space<vmem>>, vector<1x32x96xf32>
    %25 = vector.shape_cast %24 : vector<1x32x96xf32> to vector<32x96xf32>
    %cst_12 = arith.constant dense<0.000000e+00> : vector<2x96xf32>
    %26 = tpu.matmul %23, %25, %cst_12 {dimension_numbers = #tpu.dot_dimension_numbers<[1], [0], [0], [1], [0, 0, 1, 1], [], []>} : vector<2x32xf32>, vector<32x96xf32>, vector<2x96xf32> -> vector<2x96xf32>
    %c0_13 = arith.constant 0 : index
    %c0_14 = arith.constant 0 : index
    %c0_15 = arith.constant 0 : index
    %27 = vector.load %arg5[%c0_13, %c0_14, %c0_15] : memref<3x1x128xf32, #tpu.memory_space<vmem>>, vector<1x1x96xf32>
    %28 = vector.shape_cast %27 : vector<1x1x96xf32> to vector<1x96xf32>
    %29 = vector.broadcast %28 : vector<1x96xf32> to vector<2x96xf32>
    %30 = arith.addf %26, %29 : vector<2x96xf32>
    %c1_16 = arith.constant 1 : index
    %c0_17 = arith.constant 0 : index
    %c0_18 = arith.constant 0 : index
    %31 = vector.load %arg2[%c1_16, %c0_17, %c0_18] : memref<2x2x32xf32, #tpu.memory_space<vmem>>, vector<1x2x32xf32>
    %32 = vector.shape_cast %31 : vector<1x2x32xf32> to vector<2x32xf32>
    %c1_19 = arith.constant 1 : index
    %c32_20 = arith.constant 32 : index
    %c0_21 = arith.constant 0 : index
    %33 = vector.load %arg4[%c1_19, %c32_20, %c0_21] : memref<2x64x96xf32, #tpu.memory_space<vmem>>, vector<1x32x96xf32>
    %34 = vector.shape_cast %33 : vector<1x32x96xf32> to vector<32x96xf32>
    %cst_22 = arith.constant dense<0.000000e+00> : vector<2x96xf32>
    %35 = tpu.matmul %32, %34, %cst_22 {dimension_numbers = #tpu.dot_dimension_numbers<[1], [0], [0], [1], [0, 0, 1, 1], [], []>} : vector<2x32xf32>, vector<32x96xf32>, vector<2x96xf32> -> vector<2x96xf32>
    %c1_23 = arith.constant 1 : index
    %c0_24 = arith.constant 0 : index
    %c0_25 = arith.constant 0 : index
    %36 = vector.load %arg5[%c1_23, %c0_24, %c0_25] : memref<3x1x128xf32, #tpu.memory_space<vmem>>, vector<1x1x96xf32>
    %37 = vector.shape_cast %36 : vector<1x1x96xf32> to vector<1x96xf32>
    %38 = vector.broadcast %37 : vector<1x96xf32> to vector<2x96xf32>
    %39 = arith.addf %35, %38 : vector<2x96xf32>
    %c0_26 = arith.constant 0 : index
    %c0_27 = arith.constant 0 : index
    %c0_28 = arith.constant 0 : index
    %40 = vector.load %arg4[%c0_26, %c0_27, %c0_28] : memref<2x64x96xf32, #tpu.memory_space<vmem>>, vector<1x32x96xf32>
    %41 = vector.shape_cast %40 : vector<1x32x96xf32> to vector<32x96xf32>
    %cst_29 = arith.constant dense<0.000000e+00> : vector<2x96xf32>
    %42 = tpu.matmul %21, %41, %cst_29 {dimension_numbers = #tpu.dot_dimension_numbers<[1], [0], [0], [1], [0, 0, 1, 1], [], []>} : vector<2x32xf32>, vector<32x96xf32>, vector<2x96xf32> -> vector<2x96xf32>
    %43 = arith.addf %42, %30 : vector<2x96xf32>
    %44 = arith.negf %43 : vector<2x96xf32>
    %45 = math.exp %44 : vector<2x96xf32>
    %cst_30 = arith.constant 1.000000e+00 : f32
    %46 = vector.broadcast %cst_30 : f32 to vector<2x96xf32>
    %47 = arith.addf %46, %45 : vector<2x96xf32>
    %48 = arith.divf %46, %47 : vector<2x96xf32>
    %49 = math.tanh %43 : vector<2x96xf32>
    %50 = vector.extract_strided_slice %48 {offsets = [0, 0], sizes = [2, 32], strides = [1, 1]} : vector<2x96xf32> to vector<2x32xf32>
    %51 = vector.extract_strided_slice %49 {offsets = [0, 32], sizes = [2, 32], strides = [1, 1]} : vector<2x96xf32> to vector<2x32xf32>
    %52 = vector.extract_strided_slice %48 {offsets = [0, 64], sizes = [2, 32], strides = [1, 1]} : vector<2x96xf32> to vector<2x32xf32>
    %53 = arith.mulf %50, %51 : vector<2x32xf32>
    %54 = math.tanh %53 : vector<2x32xf32>
    %55 = arith.mulf %52, %54 : vector<2x32xf32>
    %c1_31 = arith.constant 1 : index
    %c0_32 = arith.constant 0 : index
    %c0_33 = arith.constant 0 : index
    %56 = vector.load %arg4[%c1_31, %c0_32, %c0_33] : memref<2x64x96xf32, #tpu.memory_space<vmem>>, vector<1x32x96xf32>
    %57 = vector.shape_cast %56 : vector<1x32x96xf32> to vector<32x96xf32>
    %cst_34 = arith.constant dense<0.000000e+00> : vector<2x96xf32>
    %58 = tpu.matmul %55, %57, %cst_34 {dimension_numbers = #tpu.dot_dimension_numbers<[1], [0], [0], [1], [0, 0, 1, 1], [], []>} : vector<2x32xf32>, vector<32x96xf32>, vector<2x96xf32> -> vector<2x96xf32>
    %59 = arith.addf %58, %39 : vector<2x96xf32>
    %60 = arith.negf %59 : vector<2x96xf32>
    %61 = math.exp %60 : vector<2x96xf32>
    %cst_35 = arith.constant 1.000000e+00 : f32
    %62 = vector.broadcast %cst_35 : f32 to vector<2x96xf32>
    %63 = arith.addf %62, %61 : vector<2x96xf32>
    %64 = arith.divf %62, %63 : vector<2x96xf32>
    %65 = math.tanh %59 : vector<2x96xf32>
    %66 = vector.extract_strided_slice %64 {offsets = [0, 0], sizes = [2, 32], strides = [1, 1]} : vector<2x96xf32> to vector<2x32xf32>
    %67 = vector.extract_strided_slice %65 {offsets = [0, 32], sizes = [2, 32], strides = [1, 1]} : vector<2x96xf32> to vector<2x32xf32>
    %68 = vector.extract_strided_slice %64 {offsets = [0, 64], sizes = [2, 32], strides = [1, 1]} : vector<2x96xf32> to vector<2x32xf32>
    %69 = arith.mulf %66, %67 : vector<2x32xf32>
    %70 = math.tanh %69 : vector<2x32xf32>
    %71 = arith.mulf %68, %70 : vector<2x32xf32>
    %c0_36 = arith.constant 0 : index
    %c0_37 = arith.constant 0 : index
    %72 = vector.load %arg6[%c0_36, %c0_37] : memref<32x128xf32, #tpu.memory_space<vmem>>, vector<32x128xf32>
    %cst_38 = arith.constant dense<0.000000e+00> : vector<2x128xf32>
    %73 = tpu.matmul %71, %72, %cst_38 {dimension_numbers = #tpu.dot_dimension_numbers<[1], [0], [0], [1], [0, 0, 1, 1], [], []>} : vector<2x32xf32>, vector<32x128xf32>, vector<2x128xf32> -> vector<2x128xf32>
    %c2 = arith.constant 2 : index
    %c0_39 = arith.constant 0 : index
    %c0_40 = arith.constant 0 : index
    %74 = vector.load %arg5[%c2, %c0_39, %c0_40] : memref<3x1x128xf32, #tpu.memory_space<vmem>>, vector<1x1x128xf32>
    %75 = vector.shape_cast %74 : vector<1x1x128xf32> to vector<1x128xf32>
    %76 = vector.broadcast %75 : vector<1x128xf32> to vector<2x128xf32>
    %77 = arith.addf %73, %76 : vector<2x128xf32>
    %78 = tpu.iota {dimensions = array<i32: 1>} : vector<2x128xi32>
    %c17_i32 = arith.constant 17 : i32
    %79 = vector.broadcast %c17_i32 : i32 to vector<2x128xi32>
    %80 = arith.cmpi eq, %78, %79 : vector<2x128xi32>
    %81 = arith.negf %77 : vector<2x128xf32>
    %82 = math.exp %81 : vector<2x128xf32>
    %cst_41 = arith.constant 1.000000e+00 : f32
    %83 = vector.broadcast %cst_41 : f32 to vector<2x128xf32>
    %84 = arith.addf %83, %82 : vector<2x128xf32>
    %85 = arith.divf %83, %84 : vector<2x128xf32>
    %86 = arith.select %80, %85, %77 : vector<2x128xi1>, vector<2x128xf32>
    %c0_42 = arith.constant 0 : index
    %c0_43 = arith.constant 0 : index
    %87 = vector.load %arg7[%c0_42, %c0_43] : memref<2x128xf32, #tpu.memory_space<vmem>>, vector<2x128xf32>
    tpu.vector_store %arg7[%c0_42, %c0_43], %86 {strides = array<i32>} : memref<2x128xf32, #tpu.memory_space<vmem>>, vector<2x128xf32>,
    return
  }
}

</mosaic_0001>

<bundles_post_ra>
// kernel: mind_decoder_forward.1
= control target key start
LH: loop header
LB: loop body
LE: loop exit
PB: predicated region body
PF: predicated region fallthrough
CT: control target
= control target key end

     0   :  { %12 = vsyncpa [#allocation4], 0  ;;  %s1204_s0 = inlined_call_operand.vmem [shape: s32[2], index: 0, kind: input, shape index: {}]   ;;  %s1205_s1 = inlined_call_operand.vmem [shape: f32[2,16], index: 1, kind: input, shape index: {}]   ;;  %s1206_s2 = inlined_call_operand.hbm [shape: f32[2,2,32], index: 2, kind: input, shape index: {}]   ;;  %s1207_s3 = inlined_call_operand.hbm [shape: f32[20,32], index: 3, kind: input, shape index: {}]   ;;  %s1208_s4 = inlined_call_operand.hbm [shape: f32[2,64,96], index: 4, kind: input, shape index: {}]   ;;  %s1209_s5 = inlined_call_operand.vmem [shape: f32[3,1,128], index: 5, kind: input, shape index: {}]   ;;  %s1210_s6 = inlined_call_operand.hbm [shape: f32[32,128], index: 6, kind: input, shape index: {}]   ;;  %s1211_s7 = inlined_call_operand.vmem [shape: f32[2,128], index: 7, kind: output, shape index: {}]  }
   0x1   :  { %13 = vsyncpa [#allocation3], 0 }
   0x2   :  { %14 = vsyncpa [#allocation7], 0 }
   0x3   :  { %15 = vsyncpa [#allocation10], 0  ;;  %s1033_s24 = smov [#allocation6]   ;;  %s22_s28 = sshll.u32 %s1204_s0, 4  ;;  %s23_s28 = int_to_ptr.vmem [resolvable:$true] %s22_s28 }
   0x4   :  { %s45_s25 = sshll.u32 %s1033_s24, 4  ;;  %s925_s8 = scalar_lea.hbm %s1207_s3, 384  ;;  %s46_s25 = int_to_ptr.vmem [resolvable:$true] %s45_s25 }
   0x5   :  { %p926_p0 = scmp.ne.s32.totalorder %s1207_s3, %s925_s8  ;;  %p929_p1 = scmp.lt.u32.totalorder %s925_s8, %s1207_s3 }
   0x7   :  { %p931_p2 = pnand %p929_p1, %p926_p0 }
   0x9   :  { %934 = shalt.err (!%p931_p2)
}
   0xa   :  { %s935_s13 = scalar_lea.vmem %s46_s25, 384  ;;  %p940_p4 = scmp.lt.s32.totalorder %s46_s25, %s46_s25 }
   0xb   :  { %p936_p3 = scmp.ne.s32.totalorder %s46_s25, %s935_s13  ;;  %p941_p5 = scmp.lt.s32.totalorder %s935_s13, %s935_s13 }
   0xd   :  { %p942_p6 = por %p941_p5, %p940_p4 }
   0xf   :  { %p943_p7 = pnand %p942_p6, %p936_p3 }
  0x11   :  { %946 = shalt.err (!%p943_p7)
}
  0x12   :  { %s1034_s0 = smov 128   ;;  %s1035_s14 = smov 8  }
  0x13   :  { %51 = dma.hbm_to_vmem [thread:$0]  %s1207_s3, 384, %s46_s25, [#allocation7], %s1034_s0, %s1034_s0, %s1035_s14  }
  0x14   :  { %s947_s17 = scalar_lea.vmem %s23_s28, 16  ;;  %p952_p9 = scmp.lt.s32.totalorder %s23_s28, %s23_s28 }
  0x15   :  { %p948_p8 = scmp.ne.s32.totalorder %s23_s28, %s947_s17  ;;  %p953_p10 = scmp.lt.s32.totalorder %s947_s17, %s947_s17 }
  0x17   :  { %p954_p11 = por %p953_p10, %p952_p9 }
  0x19   :  { %p955_p12 = pnand %p954_p11, %p948_p8 }
  0x1b   :  { %958 = shalt.err (!%p955_p12)
}
  0x1c   :  { %s1036_s18 = smov [#allocation2]   ;;  %s1037_s19 = smov [#allocation5]  }
  0x1d   :  { %25 = dma.vmem_to_smem %s23_s28, 16, %s1036_s18, [#allocation4]  }
  0x1e   :  { %s33_s20 = sshll.u32 %s1037_s19, 4  ;;  %s959_s23 = scalar_lea.hbm %s1206_s2, 64  ;;  %s34_s20 = int_to_ptr.vmem [resolvable:$true] %s33_s20 }
  0x1f   :  { %p960_p13 = scmp.ne.s32.totalorder %s1206_s2, %s959_s23  ;;  %p963_p0 = scmp.lt.u32.totalorder %s959_s23, %s1206_s2 }
  0x21   :  { %p965_p1 = pnand %p963_p0, %p960_p13 }
  0x23   :  { %968 = shalt.err (!%p965_p1)
}
  0x24   :  { %s969_s27 = scalar_lea.vmem %s34_s20, 64  ;;  %p974_p3 = scmp.lt.s32.totalorder %s34_s20, %s34_s20 }
  0x25   :  { %p970_p2 = scmp.ne.s32.totalorder %s34_s20, %s969_s27  ;;  %p975_p4 = scmp.lt.s32.totalorder %s969_s27, %s969_s27 }
  0x27   :  { %p976_p5 = por %p975_p4, %p974_p3 }
  0x29   :  { %p977_p6 = pnand %p976_p5, %p970_p2 }
  0x2b   :  { %980 = shalt.err (!%p977_p6)
}
  0x2c   :  { %s1038_s28 = smov 32   ;;  %s1039_s29 = smov 2  }
  0x2d   :  { %39 = dma.hbm_to_vmem [thread:$0]  %s1206_s2, 64, %s34_s20, [#allocation3], %s1038_s28, %s1038_s28, %s1039_s29  }
  0x2e   :  { %s1040_s9 = smov [#allocation8]   ;;  %s1041_s11 = smov [#allocation9]  }
  0x2f   :  { %s57_s10 = sshll.u32 %s1040_s9, 4  ;;  %s71_s12 = sshll.u32 %s1041_s11, 4  ;;  %s58_s10 = int_to_ptr.vmem [resolvable:$true] %s57_s10  ;;  %s72_s12 = int_to_ptr.vmem [resolvable:$true] %s71_s12 }
  0x30   :  { %s981_s16 = scalar_lea.hbm %s1208_s4, 2048 }
  0x31   :  { %p982_p7 = scmp.ne.s32.totalorder %s1208_s4, %s981_s16  ;;  %p985_p8 = scmp.lt.u32.totalorder %s981_s16, %s1208_s4 }
  0x33   :  { %p987_p9 = pnand %p985_p8, %p982_p7 }
  0x35   :  { %990 = shalt.err (!%p987_p9)
}
  0x36   :  { %s991_s2 = scalar_lea.vmem %s58_s10, 2048  ;;  %p996_p11 = scmp.lt.s32.totalorder %s58_s10, %s58_s10 }
  0x37   :  { %p992_p10 = scmp.ne.s32.totalorder %s58_s10, %s991_s2  ;;  %p997_p12 = scmp.lt.s32.totalorder %s991_s2, %s991_s2 }
  0x39   :  { %p998_p13 = por %p997_p12, %p996_p11 }
  0x3b   :  { %p999_p0 = pnand %p998_p13, %p992_p10 }
  0x3d   :  { %1002 = shalt.err (!%p999_p0)
}
  0x3e   :  { %63 = dma.hbm_to_vmem [thread:$0]  %s1208_s4, 2048, %s58_s10, [#allocation7], %s1034_s0, %s1034_s0, %s1035_s14  }
  0x3f   :  { %s1003_s26 = scalar_lea.hbm %s1210_s6, 512 }
  0x40   :  { %p1004_p1 = scmp.ne.s32.totalorder %s1210_s6, %s1003_s26  ;;  %p1007_p2 = scmp.lt.u32.totalorder %s1003_s26, %s1210_s6 }
  0x42   :  { %p1009_p3 = pnand %p1007_p2, %p1004_p1 }
  0x44   :  { %1012 = shalt.err (!%p1009_p3)
}
  0x45   :  { %s1013_s29 = scalar_lea.vmem %s72_s12, 512  ;;  %p1018_p5 = scmp.lt.s32.totalorder %s72_s12, %s72_s12 }
  0x46   :  { %p1014_p4 = scmp.ne.s32.totalorder %s72_s12, %s1013_s29  ;;  %p1019_p6 = scmp.lt.s32.totalorder %s1013_s29, %s1013_s29 }
  0x48   :  { %p1020_p7 = por %p1019_p6, %p1018_p5 }
  0x4a   :  { %p1021_p8 = pnand %p1020_p7, %p1014_p4 }
  0x4c   :  { %1024 = shalt.err (!%p1021_p8)
}
  0x4d   :  { %77 = dma.hbm_to_vmem [thread:$0]  %s1210_s6, 512, %s72_s12, [#allocation10], %s1034_s0, %s1034_s0, %s1035_s14  }
  0x4e   :  { %1025 = dma.done.wait [#allocation4], 16  }
  0x4f   :  { %1026 = vsyncadd [#allocation4], 4294967280 }
  0x50   :  { %1027 = dma.done.wait [#allocation3], 64  }
  0x51   :  { %1028 = vsyncadd [#allocation3], 4294967232 }
  0x52   :  { %1029 = dma.done.wait [#allocation7], 2432  }
  0x53   :  { %1030 = vsyncadd [#allocation7], 4294964864 }
  0x54   :  { %1031 = dma.done.wait [#allocation10], 512  }
  0x55   :  { %1032 = vsyncadd [#allocation10], 4294966784 }
  0x56   :  { %93 = sfence }
  0x57   :  { %v112_v0 = vld [vmem:[#allocation6 + $0x10] sm:$0xf]  ;;  %vm117_vm0 = vcmask 1043456   ;;  %v1042_v1 = vmov 0.0   ;;  %vm1043_vm1 = vmmov 0   ;;  %v94_v2 = vlaneseq  ;;  %s99_s6 = sld [smem:[#allocation2]] }
  0x58   :  { %783 = vmatprep.subr.mxu0 %v1042_v1  ;;  %785 = vmatprep.mubr.msk.f32.mxu0 %vm1043_vm1, %v1042_v1  ;;  %s735_s0 = sld [smem:[#allocation2 + $0x1]]  ;;  %v1044_v3 = vmov 0.0|0.0   ;;  %v266_v4 = vld [vmem:[#allocation8 + $0x20] sm:$0xff]  ;;  %v267_v6 = vld [vmem:[#allocation8 + $0x28] sm:$0xff]  ;;  %v268_v7 = vld [vmem:[#allocation8 + $0x30] sm:$0xff]  ;;  %vm113_vm4 = vcmask 31744  }
  0x59   :  { %784 = vmatpush3.msk.msra.mxu0 %vm117_vm0, %v112_v0  ;;  %853 = vmatprep.subr.bf16.mxu1 %v1044_v3  ;;  %v95_v5 = vshrl.u32 %v94_v2, 7  ;;  %v269_v8 = vld [vmem:[#allocation8 + $0x38] sm:$0xff]  ;;  %v854_v9 = vpack.c.bf16 %v267_v6, %v266_v4  ;;  %v1154_v10 = vand.u32 127, %v94_v2  ;;  %v110_v11 = vld [vmem:[#allocation6] sm:$0xff]  ;;  %v111_v12 = vld [vmem:[#allocation6 + $0x8] sm:$0xff]  ;;  %vm277_vm6 = vcmask 261120  }
  0x5a   :  { %850 = vmatprep.subr.bf16.mxu0 %v1044_v3  ;;  %803 = vmatprep.mubr.msk.f32.mxu1 %vm1043_vm1, %v1042_v1  ;;  %v857_v13 = vpack.c.bf16 %v269_v8, %v268_v7  ;;  %v439_v17 = vld [vmem:[#allocation8] sm:$0xff]  ;;  %v440_v18 = vld [vmem:[#allocation8 + $0x8] sm:$0xff]  ;;  %v851_v20 = vpack.c.bf16 %v111_v12, %v110_v11  ;;  %v441_v24 = vld [vmem:[#allocation8 + $0x10] sm:$0xff]  ;;  %vm191_vm7 = vcmask 130048   ;;  %s1046_s11 = smov 64  }
  0x5b   :  { %vm98_vm2 = vcmp.eq.s32.totalorder %v95_v5, 0  ;;  %vm102_vm3 = vcmp.eq.s32.totalorder %v95_v5, 1  ;;  %855 = vmatpush3.bf16.msra.mxu1 %v854_v9  ;;  %v265_v22 = vld [vmem:[#allocation5] sm:$0x3]  ;;  %v866_v23 = vpack.c.bf16 %v440_v18, %v439_v17  ;;  %v442_v25 = vld [vmem:[#allocation8 + $0x18] sm:$0xff]  ;;  %v355_v42 = vld [vmem:[#allocation8 + $0x68] sm:$0xff] }
  0x5c   :  { %856 = vmatprep.subr.bf16.mxu1 %v1044_v3  ;;  %v869_v26 = vpack.c.bf16 %v442_v25, %v441_v24  ;;  %v109_v27 = vld [vmem:[%s1205_s1] sm:$0x3]  ;;  %s1045_s1 = smov 96   ;;  %v356_v43 = vld [vmem:[#allocation8 + $0x70] sm:$0xff]  ;;  %v357_v45 = vld [vmem:[#allocation8 + $0x78] sm:$0xff]  ;;  %vm718_vm8 = vcmp.eq.s32.totalorder %v1154_v10, 17 }
  0x5d   :  { %v100_v14 = vstv %s99_s6  ;;  %v740_v30 = vld [vmem:[%s1209_s5] ss:$0 sm:$0xff]  ;;  %v863_v46 = vpack.c.bf16 %v357_v45, %v356_v43  ;;  %v535_v48 = vld [vmem:[#allocation8 + $0x48] sm:$0xff]  ;;  %v352_v49 = vld [vmem:[#allocation5 + $0x2] sm:$0x3] }
  0x5e   :  { %v104_v15 = vstv %s735_s0  ;;  %v101_v16 = vsel %vm98_vm2, %v100_v14, 0  ;;  %v354_v41 = vld [vmem:[#allocation8 + $0x60] sm:$0xff]  ;;  %v536_v51 = vld [vmem:[#allocation8 + $0x50] sm:$0xff]  ;;  %v537_v52 = vld [vmem:[#allocation8 + $0x58] sm:$0xff] }
  0x5f   :  { %v105_v19 = vsel %vm102_vm3, %v104_v15, %v101_v16  ;;  %858 = vmatpush3.bf16.msra.mxu1 %v857_v13  ;;  %v860_v44 = vpack.c.bf16 %v355_v42, %v354_v41  ;;  %v534_v47 = vld [vmem:[#allocation8 + $0x40] sm:$0xff]  ;;  %v875_v54 = vpack.c.bf16 %v537_v52, %v536_v51  ;;  %v632_v7 = vld [vmem:[#allocation9 + $0x8] sm:$0xff]  ;;  %v633_v8 = vld [vmem:[#allocation9 + $0x10] sm:$0xff] }
  0x60   :  { %vm106_vm5 = vcmp.eq.s32.totalorder %v1154_v10, %v105_v19  ;;  %865 = vmatprep.subr.bf16.mxu1 %v1044_v3  ;;  %v872_v50 = vpack.c.bf16 %v535_v48, %v534_v47  ;;  %v743_v58 = vld [vmem:[%s1209_s5 + $0x1] ss:$0 sm:$0xff]  ;;  %v634_v11 = vld [vmem:[#allocation9 + $0x18] sm:$0xff]  ;;  %v750_v17 = vld [vmem:[%s1209_s5 + $0x2] ss:$0 sm:$0xff] }
  0x61   :  { %v736_v21 = vsel %vm106_vm5, 1.0, %v1042_v1  ;;  %v631_v6 = vld [vmem:[#allocation9] sm:$0xff]  ;;  %v881_v12 = vpack.c.bf16 %v634_v11, %v633_v8 }
  0x62   :  { %786 = vmatmul.mubr.msk.f32.vlgmr.msra.gmra.mrb[0].mxu0 %vm113_vm4, %v736_v21  ;;  %804 = vmatmul.mubr.msk.f32.vlgmr.msra.gmra.mrb[0].mxu1 %vm277_vm6, %v265_v22  ;;  %v878_v9 = vpack.c.bf16 %v632_v7, %v631_v6 }
  0x63   :  { %852 = vmatpush3.bf16.msra.mxu0 %v851_v20  ;;  %792 = vmatprep.mubr.msk.f32.mxu0 %vm1043_vm1, %v1042_v1 }
  0x64   :  { %859 = vmatprep.subr.bf16.mxu0 %v1044_v3  ;;  %867 = vmatpush3.bf16.msra.mxu1 %v866_v23 }
  0x65   :  { %825 = vmatprep.mubr.msk.f32.mxu1 %vm1043_vm1, %v1042_v1  ;;  %868 = vmatprep.subr.bf16.mxu1 %v1044_v3 }
  0x68   :  { %870 = vmatpush3.bf16.msra.mxu1 %v869_v26 }
  0x69   :  { %877 = vmatprep.subr.bf16.mxu1 %v1044_v3 }
  0x6a   :  { %793 = vmatmul.mubr.msk.f32.vlgmr.msra.gmra.mrb[0].mxu0 %vm191_vm7, %v109_v27 }
  0x6b   :  { %814 = vmatprep.mubr.msk.f32.mxu0 %vm1043_vm1, %v1042_v1  ;;  %861 = vmatpush3.bf16.msra.mxu0 %v860_v44 }
  0x6c   :  { %862 = vmatprep.subr.bf16.mxu0 %v1044_v3 }
  0x6f   :  { %864 = vmatpush3.bf16.msra.mxu0 %v863_v46 }
  0x70   :  { %871 = vmatprep.subr.bf16.mxu0 %v1044_v3 }
  0x72   :  { %815 = vmatmul.mubr.msk.f32.vlgmr.msra.gmra.mrb[2].mxu0 %vm277_vm6, %v352_v49 }
  0x73   :  { %873 = vmatpush3.bf16.msra.mxu0 %v872_v50  ;;  %836 = vmatprep.mubr.msk.f32.mxu0 %vm1043_vm1, %v1042_v1 }
  0x74   :  { %874 = vmatprep.subr.bf16.mxu0 %v1044_v3 }
  0x77   :  { %876 = vmatpush3.bf16.msra.mxu0 %v875_v54 }
 0x13d   :  { %v261_v28 = vpop.f32.mrb[0].mxu0 }
 0x13e   :  { %v794_v29 = vpop.f32.mrb[1].mxu0  ;;  %826 = vmatmul.mubr.msk.f32.vlgmr.msra.gmra.mrb[0].mxu1 %vm277_vm6, %v261_v28 }
 0x13f   :  { %847 = vmatprep.mubr.msk.f32.mxu1 %vm1043_vm1, %v1042_v1  ;;  %879 = vmatpush3.bf16.msra.mxu1 %v878_v9 }
 0x140   :  { %880 = vmatprep.subr.bf16.mxu1 %v1044_v3 }
 0x143   :  { %882 = vmatpush3.bf16.msra.mxu1 %v881_v12 }
 0x211   :  { %v512_v31 = vpop.f32.mrb[0].mxu1 }
 0x212   :  { %v883_v32 = vadd.f32 %v740_v30, %v512_v31  ;;  %v827_v33 = vpop.f32.mrb[1].mxu1 }
 0x214   :  { %905 = vtanh.f32 %v883_v32  ;;  %v746_v35 = vmul.f32 -1.442695, %v883_v32 }
 0x216   :  { %907 = vpow2.f32 %v746_v35 }
 0x21e   :  { %v906_v34 = vpop.eup %905 }
 0x21f   :  { %524 = vrot.lane.b32.xlu0 %v906_v34, %s1045_s1 }
 0x220   :  { %v908_v36 = vpop.eup %907 }
 0x221   :  { %v519_v37 = vadd.f32 1.0, %v908_v36 }
 0x223   :  { %909 = vrcp.f32 %v519_v37 }
 0x22d   :  { %v910_v38 = vpop.eup %909 }
 0x291   :  { %v525_v39 = vpop.permute.xlu0 %524 }
 0x292   :  { %v527_v40 = vmul.f32 %v910_v38, %v525_v39 }
 0x294   :  { %911 = vtanh.f32 %v527_v40 }
 0x29e   :  { %v912_v53 = vpop.eup %911 }
 0x29f   :  { %530 = vrot.lane.b32.xlu0 %v912_v53, %s1046_s11 }
 0x311   :  { %v531_v55 = vpop.permute.xlu0 %530 }
 0x312   :  { %v533_v56 = vmul.f32 %v910_v38, %v531_v55 }
 0x314   :  { %539 = vrot.lane.b32.xlu1 %v533_v56, %s1046_s11 }
 0x386   :  { %v540_v57 = vpop.permute.xlu1 %539 }
 0x387   :  { %837 = vmatmul.mubr.msk.f32.vlgmr.msra.gmra.mrb[2].mxu0 %vm277_vm6, %v540_v57 }
 0x45a   :  { %v609_v59 = vpop.f32.mrb[2].mxu0 }
 0x45b   :  { %v884_v60 = vadd.f32 %v743_v58, %v609_v59  ;;  %v838_v61 = vpop.f32.mrb[3].mxu0 }
 0x45d   :  { %913 = vtanh.f32 %v884_v60  ;;  %v748_v63 = vmul.f32 -1.442695, %v884_v60 }
 0x45f   :  { %915 = vpow2.f32 %v748_v63 }
 0x467   :  { %v914_v62 = vpop.eup %913 }
 0x468   :  { %621 = vrot.lane.b32.xlu1 %v914_v62, %s1045_s1 }
 0x469   :  { %v916_v0 = vpop.eup %915 }
 0x46a   :  { %v616_v1 = vadd.f32 1.0, %v916_v0 }
 0x46c   :  { %917 = vrcp.f32 %v616_v1 }
 0x476   :  { %v918_v2 = vpop.eup %917 }
 0x4da   :  { %v622_v4 = vpop.permute.xlu1 %621 }
 0x4db   :  { %v624_v5 = vmul.f32 %v918_v2, %v622_v4 }
 0x4dd   :  { %919 = vtanh.f32 %v624_v5 }
 0x4e7   :  { %v920_v13 = vpop.eup %919 }
 0x4e8   :  { %627 = vrot.lane.b32.xlu0 %v920_v13, %s1046_s11 }
 0x55a   :  { %v628_v14 = vpop.permute.xlu0 %627 }
 0x55b   :  { %v630_v15 = vmul.f32 %v918_v2, %v628_v14 }
 0x55d   :  { %644 = vrot.lane.b32.xlu1 %v630_v15, %s1046_s11 }
 0x5cf   :  { %v645_v16 = vpop.permute.xlu1 %644 }
 0x5d0   :  { %848 = vmatmul.mubr.msk.f32.vlgmr.msra.gmra.mrb[2].mxu1 %vm277_vm6, %v645_v16 }
 0x6a3   :  { %v714_v18 = vpop.f32.mrb[2].mxu1 }
 0x6a4   :  { %v715_v19 = vadd.f32 %v750_v17, %v714_v18  ;;  %v849_v20 = vpop.f32.mrb[3].mxu1 }
 0x6a6   :  { %v752_v21 = vmul.f32 -1.442695, %v715_v19 }
 0x6a8   :  { %921 = vpow2.f32 %v752_v21 }
 0x6b2   :  { %v922_v3 = vpop.eup %921 }
 0x6b3   :  { %v722_v22 = vadd.f32 1.0, %v922_v3 }
 0x6b5   :  { %923 = vrcp.f32 %v722_v22 }
 0x6bf   :  { %v924_v23 = vpop.eup %923 }
 0x6c0   :  { %v725_v24 = vsel %vm718_vm8, %v924_v23, %v715_v19 }
 0x6c1   :  { %726 = vst [vmem:[%s1211_s7] sm:$0x3] %v725_v24 }
 0x6c2   :  { %731 = vsyncpa [#allocation3], 1 }
 0x6c3   :  { %732 = vsyncpa [#allocation7], 1 }
 0x6c4   :  { %733 = vsyncpa [#allocation10], 1 }
 0x6c5   :  { %734 = vsyncpa [#allocation4], 1 }

</bundles_post_ra>
